<compile_context>
chip_gen: v7x
topology: tpu7x:2x2x1
jax: 0.10.0
libtpu: 0.0.40
codegen_flags: <defaults>
</compile_context>

<pallas_src>
import functools

import jax
import jax.numpy as jnp
from jax import lax
from jax.experimental import pallas as pl
from jax.experimental.pallas import tpu as pltpu

LANES = 128
SUBLANES = 8
MAX_BLOCK_ROWS = 512


# ----------------------------------------------------------------------------
# The eight trigram activations, indexed by the trigram binary value
# [b0, b1, b2] -> idx = 4*b0 + 2*b1 + b2 (same encoding as the PyTorch code).
# ----------------------------------------------------------------------------
def _sigmoid(x):
    return 1.0 / (1.0 + jnp.exp(-x))


def _elu(x):
    return jnp.where(x > 0, x, jnp.exp(jnp.minimum(x, 0.0)) - 1.0)


def _erf(x):
    # Abramowitz & Stegun 7.1.26 polynomial erf (abs err < 1.5e-7).
    p = 0.3275911
    a1, a2, a3, a4, a5 = 0.254829592, -0.284496736, 1.421413741, -1.453152027, 1.061405429
    s = jnp.sign(x)
    ax = jnp.abs(x)
    t = 1.0 / (1.0 + p * ax)
    poly = ((((a5 * t + a4) * t + a3) * t + a2) * t + a1) * t
    return s * (1.0 - poly * jnp.exp(-ax * ax))


def _act_kun(x):    # '000' -> sigmoid
    return _sigmoid(x)


def _act_zhen(x):   # '001' -> leaky_relu(0.2)
    return jnp.where(x >= 0, x, 0.2 * x)


def _act_kan(x):    # '010' -> tanh
    return jnp.tanh(x)


def _act_dui(x):    # '011' -> elu(x) + 0.2*x
    return _elu(x) + 0.2 * x


def _act_gen(x):    # '100' -> gelu(clamp(x,-5,5)), exact (erf) gelu
    xc = jnp.clip(x, -5.0, 5.0)
    return 0.5 * xc * (1.0 + _erf(xc * 0.7071067811865476))


def _act_li(x):     # '101' -> x * sigmoid(1.2*x)
    return x * _sigmoid(1.2 * x)


def _act_xun(x):    # '110' -> softplus (PyTorch threshold=20)
    return jnp.where(x > 20.0, x, jnp.log(1.0 + jnp.exp(jnp.minimum(x, 20.0))))


def _act_qian(x):   # '111' -> elu(x) + 0.5*tanh(x)
    return _elu(x) + 0.5 * jnp.tanh(x)


_ACTS_BY_BINARY = (_act_kun, _act_zhen, _act_kan, _act_dui,
                   _act_gen, _act_li, _act_xun, _act_qian)


# ----------------------------------------------------------------------------
# Kernel 1: tiled, accumulating global statistics.
# Output lanes: [sum, sum_sq, max, min, n_small, n_pos, 0, 0]
# ----------------------------------------------------------------------------
def _stats_kernel(x_ref, o_ref, *, block_rows, full_rows, rem, has_padding):
    i = pl.program_id(0)

    @pl.when(i == 0)
    def _():
        col = lax.broadcasted_iota(jnp.int32, (1, 8), 1)
        neg_inf = jnp.full((1, 8), -jnp.inf, jnp.float32)
        pos_inf = jnp.full((1, 8), jnp.inf, jnp.float32)
        zeros = jnp.zeros((1, 8), jnp.float32)
        o_ref[...] = jnp.where(col == 2, neg_inf,
                               jnp.where(col == 3, pos_inf, zeros))

    x = x_ref[...].astype(jnp.float32)

    # Reduce sublanes (rows, plain VALU adds) first, then a single cross-lane
    # XLU reduction per statistic.
    def rsum(v):
        return jnp.sum(jnp.sum(v, axis=0, keepdims=True), axis=1, keepdims=True)

    def rmax(v):
        return jnp.max(jnp.max(v, axis=0, keepdims=True), axis=1, keepdims=True)

    def rmin(v):
        return jnp.min(jnp.min(v, axis=0, keepdims=True), axis=1, keepdims=True)

    one = jnp.float32(1.0)
    zero = jnp.float32(0.0)

    small = jnp.where(jnp.abs(x) < 0.01, one, zero)
    x_for_max = x
    x_for_min = x
    if has_padding:
        # Padding is zeros, so sum / sum_sq / n_pos need no mask.  Mask only
        # max / min / n_small.  Compare (row, col) directly (no flat int32 index).
        grow = i * block_rows + lax.broadcasted_iota(jnp.int32, x.shape, 0)
        col = lax.broadcasted_iota(jnp.int32, x.shape, 1)
        valid = (grow < full_rows) | ((grow == full_rows) & (col < rem))
        x_for_max = jnp.where(valid, x, -jnp.inf)
        x_for_min = jnp.where(valid, x, jnp.inf)
        small = jnp.where(valid, small, zero)

    s = rsum(x)
    ss = rsum(x * x)
    mx = rmax(x_for_max)
    mn = rmin(x_for_min)
    nsm = rsum(small)
    npos = rsum(jnp.where(x > zero, one, zero))

    col8 = lax.broadcasted_iota(jnp.int32, (1, 8), 1)
    chunk = (jnp.where(col8 == 0, s, zero)
             + jnp.where(col8 == 1, ss, zero)
             + jnp.where(col8 == 2, mx, zero)
             + jnp.where(col8 == 3, mn, zero)
             + jnp.where(col8 == 4, nsm, zero)
             + jnp.where(col8 == 5, npos, zero))

    prev = o_ref[...]
    merged = jnp.where(col8 == 2, jnp.maximum(prev, chunk),
                       jnp.where(col8 == 3, jnp.minimum(prev, chunk),
                                 prev + chunk))
    o_ref[...] = merged


# ----------------------------------------------------------------------------
# Kernel 2: composite hexagram activation.
#   result = where(x >= 0, act[upper](x), -act[lower](-x))
# upper/lower trigram indices arrive via scalar prefetch (SMEM); only the selected
# activation per side is evaluated (pl.when-guarded branches -> VMEM scratch).
# ----------------------------------------------------------------------------
def _hexagram_kernel(tri_ref, x_ref, o_ref, pos_scr, neg_scr):
    x = x_ref[...].astype(jnp.float32)
    upper = tri_ref[0]
    lower = tri_ref[1]

    for idx, act in enumerate(_ACTS_BY_BINARY):
        @pl.when(upper == idx)
        def _(act=act):
            pos_scr[...] = act(x)

        @pl.when(lower == idx)
        def _(act=act):
            neg_scr[...] = -act(-x)

    o_ref[...] = jnp.where(x >= 0, pos_scr[...], neg_scr[...]).astype(o_ref.dtype)


# ----------------------------------------------------------------------------
# Wrapper
# ----------------------------------------------------------------------------
def hexagram_activation(x):
    orig_shape = x.shape
    orig_dtype = x.dtype
    xflat = x.reshape(-1)
    n = xflat.shape[0]

    # Choose a row-chunk size: multiple of 8, at most MAX_BLOCK_ROWS, and keep the
    # grid length >= 2 when there is enough data (v7x has 2 TensorCores).
    rows = pl.cdiv(n, LANES)
    rows8 = pl.cdiv(rows, SUBLANES) * SUBLANES
    num_chunks = max(pl.cdiv(rows8, MAX_BLOCK_ROWS), 2 if rows8 > SUBLANES else 1)
    block_rows = pl.cdiv(pl.cdiv(rows8, num_chunks), SUBLANES) * SUBLANES
    num_chunks = pl.cdiv(rows8, block_rows)
    rows_final = num_chunks * block_rows

    total = rows_final * LANES
    has_padding = (total != n)
    if has_padding:
        xflat = jnp.pad(xflat, (0, total - n))
    xp = xflat.reshape(rows_final, LANES)

    full_rows = n // LANES
    rem = n % LANES

    # ---- stats reduction kernel (tiled + accumulated) ----
    stats_kernel = functools.partial(
        _stats_kernel, block_rows=block_rows, full_rows=full_rows,
        rem=rem, has_padding=has_padding)

    stats = pl.pallas_call(
        stats_kernel,
        out_shape=jax.ShapeDtypeStruct((1, 8), jnp.float32),
        grid=(num_chunks,),
        in_specs=[pl.BlockSpec((block_rows, LANES), lambda i: (i, 0))],
        out_specs=pl.BlockSpec((1, 8), lambda i: (0, 0)),
        compiler_params=pltpu.CompilerParams(dimension_semantics=("arbitrary",)),
    )(xp)

    s = stats[0, 0]
    ss = stats[0, 1]
    mx = stats[0, 2]
    mn = stats[0, 3]
    nsmall = stats[0, 4]
    npos = stats[0, 5]

    nf = jnp.float32(n)
    mean = s / nf
    var = jnp.maximum(ss - nf * mean * mean, 0.0) / jnp.maximum(nf - 1.0, 1.0)
    std = jnp.sqrt(var)  # torch.std default: unbiased (ddof=1)
    sparsity = nsmall / nf

    # The six hexagram lines (data-dependent, traced).
    l0 = (mean > 0.0).astype(jnp.int32)
    l1 = (std > 0.5).astype(jnp.int32)
    l2 = ((mx - mn) > 1.0).astype(jnp.int32)
    l3 = (sparsity < 0.5).astype(jnp.int32)
    l4 = (jnp.abs(mean) < std).astype(jnp.int32)
    l5 = (npos > nf / 2.0).astype(jnp.int32)

    upper_idx = l0 * 4 + l1 * 2 + l2   # trigram binary value
    lower_idx = l3 * 4 + l4 * 2 + l5
    tri = jnp.stack([upper_idx, lower_idx]).astype(jnp.int32)

    # ---- elementwise activation kernel ----
    out = pl.pallas_call(
        _hexagram_kernel,
        out_shape=jax.ShapeDtypeStruct((rows_final, LANES), orig_dtype),
        grid_spec=pltpu.PrefetchScalarGridSpec(
            num_scalar_prefetch=1,
            grid=(num_chunks,),
            in_specs=[pl.BlockSpec((block_rows, LANES), lambda i, tri: (i, 0))],
            out_specs=pl.BlockSpec((block_rows, LANES), lambda i, tri: (i, 0)),
            scratch_shapes=[pltpu.VMEM((block_rows, LANES), jnp.float32),
                            pltpu.VMEM((block_rows, LANES), jnp.float32)]),
        compiler_params=pltpu.CompilerParams(dimension_semantics=("parallel",)),
    )(tri, xp)

    out = out.reshape(-1)
    if has_padding:
        out = out[:n]
    return out.reshape(orig_shape)


# ----------------------------------------------------------------------------
# Pure-JAX reference (mirrors the PyTorch forward)
# ----------------------------------------------------------------------------
def hexagram_activation_ref(x):
    xf = x.astype(jnp.float32)
    n = xf.size
    mean = jnp.mean(xf)
    std = jnp.std(xf, ddof=1)
    mx = jnp.max(xf)
    mn = jnp.min(xf)
    sparsity = jnp.mean((jnp.abs(xf) < 0.01).astype(jnp.float32))
    npos = jnp.sum((xf > 0).astype(jnp.float32))

    l0 = (mean > 0.0).astype(jnp.int32)
    l1 = (std > 0.5).astype(jnp.int32)
    l2 = ((mx - mn) > 1.0).astype(jnp.int32)
    l3 = (sparsity < 0.5).astype(jnp.int32)
    l4 = (jnp.abs(mean) < std).astype(jnp.int32)
    l5 = (npos > n / 2.0).astype(jnp.int32)

    upper_idx = l0 * 4 + l1 * 2 + l2
    lower_idx = l3 * 4 + l4 * 2 + l5

    def sel(idx, v):
        out = jnp.zeros_like(v)
        for i, f in enumerate(_ACTS_BY_BINARY):
            out = out + jnp.where(idx == i, 1.0, 0.0) * f(v)
        return out

    pos_val = sel(upper_idx, xf)
    neg_val = -sel(lower_idx, -xf)
    return jnp.where(xf >= 0, pos_val, neg_val).astype(x.dtype)


if __name__ == "__main__":
    key = jax.random.PRNGKey(0)
    x = jax.random.normal(key, (2, 4, 16, 16), dtype=jnp.float32)  # NCHW

    y = hexagram_activation(x)
    jax.block_until_ready(y)

    y_ref = hexagram_activation_ref(x)
    assert y.shape == x.shape and y.dtype == x.dtype
    max_err = float(jnp.max(jnp.abs(y - y_ref)))
    assert max_err < 1e-4, f"mismatch vs reference: {max_err}"

    print("KERNEL_OK")
</pallas_src>

<mosaic_0001>
module attributes {stable_mosaic.version = 11 : i64} {
  func.func @_stats_kernel(%arg0: i32, %arg1: memref<8x128xf32, #tpu.memory_space<vmem>>, %arg2: memref<1x8xf32, #tpu.memory_space<vmem>>) attributes {dimension_semantics = [#tpu.dimension_semantics<arbitrary>], iteration_bounds = array<i64: 2>, scalar_prefetch = 0 : i64, scratch_operands = 0 : i64, tpu.core_type = #tpu.core_type<tc>, window_params = [{transform_indices = @transform_0, window_bounds = array<i64: 8, 128>}, {pipeline_mode = #tpu.pipeline_mode<synchronous>, transform_indices = @transform_1, window_bounds = array<i64: 1, 8>}]} {
    %c0_i32 = arith.constant 0 : i32
    %0 = arith.cmpi eq, %arg0, %c0_i32 : i32
    %1 = arith.extui %0 : i1 to i32
    %c0_i32_0 = arith.constant 0 : i32
    %2 = arith.cmpi ne, %1, %c0_i32_0 : i32
    scf.if %2 {
      %93 = tpu.iota {dimensions = array<i32: 1>} : vector<1x8xi32>
      %cst_32 = arith.constant 0xFF800000 : f32
      %94 = vector.broadcast %cst_32 : f32 to vector<1x8xf32>
      %cst_33 = arith.constant 0x7F800000 : f32
      %95 = vector.broadcast %cst_33 : f32 to vector<1x8xf32>
      %cst_34 = arith.constant 0.000000e+00 : f32
      %96 = vector.broadcast %cst_34 : f32 to vector<1x8xf32>
      %c2_i32_35 = arith.constant 2 : i32
      %97 = vector.broadcast %c2_i32_35 : i32 to vector<1x8xi32>
      %98 = arith.cmpi eq, %93, %97 : vector<1x8xi32>
      %c3_i32_36 = arith.constant 3 : i32
      %99 = vector.broadcast %c3_i32_36 : i32 to vector<1x8xi32>
      %100 = arith.cmpi eq, %93, %99 : vector<1x8xi32>
      %101 = arith.select %100, %95, %96 : vector<1x8xi1>, vector<1x8xf32>
      %102 = arith.select %98, %94, %101 : vector<1x8xi1>, vector<1x8xf32>
      %c0_37 = arith.constant 0 : index
      %c0_38 = arith.constant 0 : index
      %103 = vector.load %arg2[%c0_37, %c0_38] : memref<1x8xf32, #tpu.memory_space<vmem>>, vector<1x8xf32>
      tpu.vector_store %arg2[%c0_37, %c0_38], %102 {strides = array<i32>} : memref<1x8xf32, #tpu.memory_space<vmem>>, vector<1x8xf32>,
    } else {
    }
    %c0 = arith.constant 0 : index
    %c0_1 = arith.constant 0 : index
    %3 = vector.load %arg1[%c0, %c0_1] : memref<8x128xf32, #tpu.memory_space<vmem>>, vector<8x128xf32>
    %4 = math.absf %3 : vector<8x128xf32>
    %cst = arith.constant 0.00999999977 : f32
    %5 = vector.broadcast %cst : f32 to vector<8x128xf32>
    %6 = arith.cmpf olt, %4, %5 : vector<8x128xf32>
    %cst_2 = arith.constant 1.000000e+00 : f32
    %cst_3 = arith.constant 0.000000e+00 : f32
    %7 = vector.broadcast %cst_2 : f32 to vector<8x128xf32>
    %8 = vector.broadcast %cst_3 : f32 to vector<8x128xf32>
    %9 = arith.select %6, %7, %8 : vector<8x128xi1>, vector<8x128xf32>
    %cst_4 = arith.constant dense<0.000000e+00> : vector<128xf32>
    %10 = vector.multi_reduction <add>, %3, %cst_4 [0] : vector<8x128xf32> to vector<128xf32>
    %11 = vector.shape_cast %10 : vector<128xf32> to vector<1x128xf32>
    %cst_5 = arith.constant dense<0.000000e+00> : vector<1xf32>
    %12 = vector.multi_reduction <add>, %11, %cst_5 [1] : vector<1x128xf32> to vector<1xf32>
    %13 = vector.shape_cast %12 : vector<1xf32> to vector<1x1xf32>
    %14 = arith.mulf %3, %3 : vector<8x128xf32>
    %cst_6 = arith.constant dense<0.000000e+00> : vector<128xf32>
    %15 = vector.multi_reduction <add>, %14, %cst_6 [0] : vector<8x128xf32> to vector<128xf32>
    %16 = vector.shape_cast %15 : vector<128xf32> to vector<1x128xf32>
    %cst_7 = arith.constant dense<0.000000e+00> : vector<1xf32>
    %17 = vector.multi_reduction <add>, %16, %cst_7 [1] : vector<1x128xf32> to vector<1xf32>
    %18 = vector.shape_cast %17 : vector<1xf32> to vector<1x1xf32>
    %cst_8 = arith.constant dense<0xFF800000> : vector<128xf32>
    %19 = vector.multi_reduction <maximumf>, %3, %cst_8 [0] : vector<8x128xf32> to vector<128xf32>
    %20 = vector.shape_cast %19 : vector<128xf32> to vector<1x128xf32>
    %cst_9 = arith.constant dense<0xFF800000> : vector<1xf32>
    %21 = vector.multi_reduction <maximumf>, %20, %cst_9 [1] : vector<1x128xf32> to vector<1xf32>
    %22 = vector.shape_cast %21 : vector<1xf32> to vector<1x1xf32>
    %cst_10 = arith.constant dense<0x7F800000> : vector<128xf32>
    %23 = vector.multi_reduction <minimumf>, %3, %cst_10 [0] : vector<8x128xf32> to vector<128xf32>
    %24 = vector.shape_cast %23 : vector<128xf32> to vector<1x128xf32>
    %cst_11 = arith.constant dense<0x7F800000> : vector<1xf32>
    %25 = vector.multi_reduction <minimumf>, %24, %cst_11 [1] : vector<1x128xf32> to vector<1xf32>
    %26 = vector.shape_cast %25 : vector<1xf32> to vector<1x1xf32>
    %cst_12 = arith.constant dense<0.000000e+00> : vector<128xf32>
    %27 = vector.multi_reduction <add>, %9, %cst_12 [0] : vector<8x128xf32> to vector<128xf32>
    %28 = vector.shape_cast %27 : vector<128xf32> to vector<1x128xf32>
    %cst_13 = arith.constant dense<0.000000e+00> : vector<1xf32>
    %29 = vector.multi_reduction <add>, %28, %cst_13 [1] : vector<1x128xf32> to vector<1xf32>
    %30 = vector.shape_cast %29 : vector<1xf32> to vector<1x1xf32>
    %cst_14 = arith.constant 0.000000e+00 : f32
    %31 = vector.broadcast %cst_14 : f32 to vector<8x128xf32>
    %32 = arith.cmpf ogt, %3, %31 : vector<8x128xf32>
    %cst_15 = arith.constant 1.000000e+00 : f32
    %cst_16 = arith.constant 0.000000e+00 : f32
    %33 = vector.broadcast %cst_15 : f32 to vector<8x128xf32>
    %34 = vector.broadcast %cst_16 : f32 to vector<8x128xf32>
    %35 = arith.select %32, %33, %34 : vector<8x128xi1>, vector<8x128xf32>
    %cst_17 = arith.constant dense<0.000000e+00> : vector<128xf32>
    %36 = vector.multi_reduction <add>, %35, %cst_17 [0] : vector<8x128xf32> to vector<128xf32>
    %37 = vector.shape_cast %36 : vector<128xf32> to vector<1x128xf32>
    %cst_18 = arith.constant dense<0.000000e+00> : vector<1xf32>
    %38 = vector.multi_reduction <add>, %37, %cst_18 [1] : vector<1x128xf32> to vector<1xf32>
    %39 = vector.shape_cast %38 : vector<1xf32> to vector<1x1xf32>
    %40 = tpu.iota {dimensions = array<i32: 1>} : vector<1x8xi32>
    %c0_i32_19 = arith.constant 0 : i32
    %41 = vector.broadcast %c0_i32_19 : i32 to vector<1x8xi32>
    %42 = arith.cmpi eq, %40, %41 : vector<1x8xi32>
    %cst_20 = arith.constant 0.000000e+00 : f32
    %43 = vector.shape_cast %13 : vector<1x1xf32> to vector<1x1xf32>
    %44 = vector.broadcast %43 : vector<1x1xf32> to vector<1x8xf32>
    %45 = vector.broadcast %cst_20 : f32 to vector<1x8xf32>
    %46 = arith.select %42, %44, %45 : vector<1x8xi1>, vector<1x8xf32>
    %c1_i32 = arith.constant 1 : i32
    %47 = vector.broadcast %c1_i32 : i32 to vector<1x8xi32>
    %48 = arith.cmpi eq, %40, %47 : vector<1x8xi32>
    %cst_21 = arith.constant 0.000000e+00 : f32
    %49 = vector.shape_cast %18 : vector<1x1xf32> to vector<1x1xf32>
    %50 = vector.broadcast %49 : vector<1x1xf32> to vector<1x8xf32>
    %51 = vector.broadcast %cst_21 : f32 to vector<1x8xf32>
    %52 = arith.select %48, %50, %51 : vector<1x8xi1>, vector<1x8xf32>
    %53 = arith.addf %46, %52 : vector<1x8xf32>
    %c2_i32 = arith.constant 2 : i32
    %54 = vector.broadcast %c2_i32 : i32 to vector<1x8xi32>
    %55 = arith.cmpi eq, %40, %54 : vector<1x8xi32>
    %cst_22 = arith.constant 0.000000e+00 : f32
    %56 = vector.shape_cast %22 : vector<1x1xf32> to vector<1x1xf32>
    %57 = vector.broadcast %56 : vector<1x1xf32> to vector<1x8xf32>
    %58 = vector.broadcast %cst_22 : f32 to vector<1x8xf32>
    %59 = arith.select %55, %57, %58 : vector<1x8xi1>, vector<1x8xf32>
    %60 = arith.addf %53, %59 : vector<1x8xf32>
    %c3_i32 = arith.constant 3 : i32
    %61 = vector.broadcast %c3_i32 : i32 to vector<1x8xi32>
    %62 = arith.cmpi eq, %40, %61 : vector<1x8xi32>
    %cst_23 = arith.constant 0.000000e+00 : f32
    %63 = vector.shape_cast %26 : vector<1x1xf32> to vector<1x1xf32>
    %64 = vector.broadcast %63 : vector<1x1xf32> to vector<1x8xf32>
    %65 = vector.broadcast %cst_23 : f32 to vector<1x8xf32>
    %66 = arith.select %62, %64, %65 : vector<1x8xi1>, vector<1x8xf32>
    %67 = arith.addf %60, %66 : vector<1x8xf32>
    %c4_i32 = arith.constant 4 : i32
    %68 = vector.broadcast %c4_i32 : i32 to vector<1x8xi32>
    %69 = arith.cmpi eq, %40, %68 : vector<1x8xi32>
    %cst_24 = arith.constant 0.000000e+00 : f32
    %70 = vector.shape_cast %30 : vector<1x1xf32> to vector<1x1xf32>
    %71 = vector.broadcast %70 : vector<1x1xf32> to vector<1x8xf32>
    %72 = vector.broadcast %cst_24 : f32 to vector<1x8xf32>
    %73 = arith.select %69, %71, %72 : vector<1x8xi1>, vector<1x8xf32>
    %74 = arith.addf %67, %73 : vector<1x8xf32>
    %c5_i32 = arith.constant 5 : i32
    %75 = vector.broadcast %c5_i32 : i32 to vector<1x8xi32>
    %76 = arith.cmpi eq, %40, %75 : vector<1x8xi32>
    %cst_25 = arith.constant 0.000000e+00 : f32
    %77 = vector.shape_cast %39 : vector<1x1xf32> to vector<1x1xf32>
    %78 = vector.broadcast %77 : vector<1x1xf32> to vector<1x8xf32>
    %79 = vector.broadcast %cst_25 : f32 to vector<1x8xf32>
    %80 = arith.select %76, %78, %79 : vector<1x8xi1>, vector<1x8xf32>
    %81 = arith.addf %74, %80 : vector<1x8xf32>
    %c0_26 = arith.constant 0 : index
    %c0_27 = arith.constant 0 : index
    %82 = vector.load %arg2[%c0_26, %c0_27] : memref<1x8xf32, #tpu.memory_space<vmem>>, vector<1x8xf32>
    %c2_i32_28 = arith.constant 2 : i32
    %83 = vector.broadcast %c2_i32_28 : i32 to vector<1x8xi32>
    %84 = arith.cmpi eq, %40, %83 : vector<1x8xi32>
    %85 = arith.maximumf %82, %81 : vector<1x8xf32>
    %c3_i32_29 = arith.constant 3 : i32
    %86 = vector.broadcast %c3_i32_29 : i32 to vector<1x8xi32>
    %87 = arith.cmpi eq, %40, %86 : vector<1x8xi32>
    %88 = arith.minimumf %82, %81 : vector<1x8xf32>
    %89 = arith.addf %82, %81 : vector<1x8xf32>
    %90 = arith.select %87, %88, %89 : vector<1x8xi1>, vector<1x8xf32>
    %91 = arith.select %84, %85, %90 : vector<1x8xi1>, vector<1x8xf32>
    %c0_30 = arith.constant 0 : index
    %c0_31 = arith.constant 0 : index
    %92 = vector.load %arg2[%c0_30, %c0_31] : memref<1x8xf32, #tpu.memory_space<vmem>>, vector<1x8xf32>
    tpu.vector_store %arg2[%c0_30, %c0_31], %91 {strides = array<i32>} : memref<1x8xf32, #tpu.memory_space<vmem>>, vector<1x8xf32>,
    return
  }
  func.func @transform_0(%arg0: i32) -> (i32, i32) {
    %c0_i32 = arith.constant 0 : i32
    %c0_i32_0 = arith.constant 0 : i32
    return %arg0, %c0_i32 : i32, i32
  }
  func.func @transform_1(%arg0: i32) -> (i32, i32) {
    %c0_i32 = arith.constant 0 : i32
    %c0_i32_0 = arith.constant 0 : i32
    %c0_i32_1 = arith.constant 0 : i32
    return %c0_i32, %c0_i32_0 : i32, i32
  }
}

</mosaic_0001>

<bundles_post_ra>
// kernel: tpu_custom_call.1
= control target key start
LH: loop header
LB: loop body
LE: loop exit
PB: predicated region body
PF: predicated region fallthrough
CT: control target
= control target key end

     0   :  { %6 = vsyncpa [#allocation3], 0  ;;  %s571_s0 = inlined_call_operand.hbm [shape: f32[16,128], index: 0, kind: input, shape index: {}]   ;;  %s572_s1 = inlined_call_operand.hbm [shape: f32[1,8], index: 1, kind: output, shape index: {}]  }
   0x1   :  { %8 = vsyncpa [#allocation3 + $0x1], 0 }
   0x2   :  { %9 = vsyncpa [#allocation4], 0  ;;  %s441_s6 = smov 0   ;;  %s443_s7 = smov 0  }
   0x3   :  { %s445_s8 = smov 0   ;;  %s447_s9 = smov 0  }
   0x4 LB: > { %s460_s10 = sadd.s32 4294967295, %s425_s9   ;;  %s463_s11 = sadd.s32 1, %s425_s9   ;;  %s425_s9 = sphi %s447_s9, %s580_s9   ;;  %s421_s8 = sphi %s445_s8, %s579_s8   ;;  %s417_s7 = sphi %s443_s7, %s578_s7   ;;  %s413_s6 = sphi %s441_s6, %s577_s6  }
   0x5   : > { %s19_s12 = ssub.s32 %s425_s9, %s463_s11  ;;  %s22_s13 = sadd.s32 1, %s421_s8 }
   0x6   : > { %p20_p0 = scmp.eq.s32.totalorder %s19_s12, 0  ;;  %p29_p1 = scmp.ne.s32.totalorder %s421_s8, %s417_s7 }
   0x7   : > { %p30_p2 = scmp.eq.s32.totalorder %s425_s9, 0  ;;  %p35_p3 = scmp.ne.s32.totalorder %s417_s7, %s413_s6 }
   0x8   : > { %s473_s14 = scalar_select %p20_p0, %s421_s8, %s22_s13  }
   0x9   : > { %p31_p4 = por %p30_p2, %p29_p1  ;;  %p36_p5 = scmp.eq.s32.totalorder %s460_s10, 0 }
   0xa   : > { %p293_p6 = scmp.lt.s32.totalorder %s425_s9, 2  ;;  %s80_s16 = sand.u32 1, %s421_s8  }
   0xb   : > { %p477_p7 = por %p36_p5, %p35_p3  ;;  %s274_s17 = sshll.u32 %s80_s16, 3 }
   0xc   : > { %s275_s18 = sshll.u32 %s425_s9, 7  ;;  %s84_s22 = scalar_lea.vmem [#allocation2], %s274_s17 }
   0xd   : > { %s486_s21 = scalar_lea.hbm %s571_s0, %s275_s18  ;;  %s91_s23 = sshll.u32 %s84_s22, 4  ;;  %s488_s23 = int_to_ptr.vmem [resolvable:$true] %s91_s23 }
   0xe   : > { %p490_p8 = pnand %p293_p6, %p31_p4  ;;  %s81_s25 = scalar_lea.sflag [#allocation3], %s80_s16 }
   0xf   : > { %s331_s26 = scalar_lea.hbm %s486_s21, 128  ;;  %s336_s29 = scalar_lea.hbm %s571_s0, 256 }
  0x10   : > { %p332_p11 = scmp.ne.s32.totalorder %s486_s21, %s331_s26  ;;  %p333_p12 = pneg %p490_p8 }
  0x11   : > { %p337_p1 = scmp.lt.u32.totalorder %s486_s21, %s571_s0  ;;  %p338_p2 = scmp.lt.u32.totalorder %s336_s29, %s331_s26 }
  0x12   : > { %p334_p13 = pnand %p333_p12, %p332_p11  ;;  %p340_p4 = scmp.lt.u32.totalorder %s331_s26, %s486_s21 }
  0x13   : > { %p339_p3 = por %p338_p2, %p337_p1 }
  0x14   : > { %p335_p0 = pneg %p334_p13 }
  0x15   : > { %p341_p5 = por %p340_p4, %p339_p3 }
  0x17   : > { %p342_p6 = pnand %p341_p5, %p335_p0 }
  0x19   : > { %345 = shalt.err (!%p342_p6)
}
  0x1a   : > { %s346_s3 = scalar_lea.vmem %s488_s23, 128  ;;  %s427_s4 = smov [#allocation2]  }
  0x1b   : > { %p347_p11 = scmp.ne.s32.totalorder %s488_s23, %s346_s3  ;;  %s351_s5 = sshll.u32 %s427_s4, 4  ;;  %s352_s5 = int_to_ptr.vmem [resolvable:$false] %s351_s5 }
  0x1c   : > { %s353_s6 = scalar_lea.vmem %s352_s5, 256  ;;  %p354_p10 = scmp.lt.s32.totalorder %s488_s23, %s352_s5 }
  0x1d   : > { %p349_p13 = pnand %p347_p11, %p333_p12  ;;  %p355_p1 = scmp.lt.s32.totalorder %s353_s6, %s346_s3 }
  0x1f   : > { %p350_p9 = pneg %p349_p13  ;;  %p356_p2 = por %p355_p1, %p354_p10 }
  0x21   : > { %p357_p3 = pnand %p356_p2, %p350_p9 }
  0x23   : > { %360 = shalt.err (!%p357_p3)
}
  0x24   : > { %292 = dma.hbm_to_vmem [thread:$0]  (!%p490_p8), %s486_s21, 128, %s488_s23, %s81_s25  }
  0x25   : > { %p575_p0 = scmp.lt.s32.totalorder %s425_s9, 3  ;;  %p576_p4 = scmp.ge.s32.totalorder %s425_s9, 1 }
  0x27   : > { %p97_p12 = pnand %p576_p4, %p575_p0 }
  0x28   : > { %s102_s12 = sand.u32 (!%p97_p12), 1, %s417_s7  }
  0x29   : > { %100 = sbr.rel (%p97_p12) target bundleno = 247 (0xf7), region = 24  ;;  %s277_s13 = sshll.u32 (!%p97_p12), %s102_s12, 3 }
  0x2a   : > { %s103_s16 = scalar_lea.sflag (!%p97_p12), [#allocation3], %s102_s12  ;;  %s106_s17 = scalar_lea.vmem (!%p97_p12), [#allocation2], %s277_s13 }
  0x30   : > { %404 = dma.done.wait (%p477_p7), %s103_s16, 128  }
  0x31   : > { %406 = vsyncadd (%p477_p7), %s103_s16, 4294967168  ;;  %p278_p9 = scmp.ne.s32.totalorder %s460_s10, 0 }
  0x32   : > { %v124_v0 = vlaneseq (!%p278_p9)  ;;  %vm130_vm2 = vcmask (!%p278_p9), 57344   ;;  %v428_v2 = vmov (!%p278_p9), 0.0  }
  0x33   : > { %123 = sbr.rel (%p278_p9) target bundleno = 58 (0x3a), region = 32 }
  0x34   : > { %v125_v1 = vand.u32 (!%p278_p9), 127, %v124_v0 }
  0x36   : > { %vm126_vm0 = vcmp.eq.s32.totalorder (!%p278_p9), %v125_v1, 2  ;;  %vm127_vm1 = vcmp.eq.s32.totalorder (!%p278_p9), %v125_v1, 3 }
  0x37   : > { %v128_v3 = vsel (!%p278_p9), %vm127_vm1, inf, %v428_v2 }
  0x38   : > { %v129_v4 = vsel (!%p278_p9), %vm126_vm0, -inf, %v128_v3 }
  0x39   : > { %131 = vst.msk [vmem:[#allocation5] sm:$0x1] (!%p278_p9), %vm130_vm2, %v129_v4 }
  0x3a PF: > { %v132_v5 = vld [vmem:[%s106_s17] sm:$0xff]  ;;  %v429_v9 = vmov 0.0   ;;  %v187_v45 = vlaneseq  ;;  %s430_s9 = smov [#allocation5]   ;;  %vm212_vm11 = vcmask 57344   ;;  %p294_p7 = scmp.eq.s32.totalorder %s460_s10, 1 }
  0x3b   : > { %v136_v6 = vrot.slane %v132_v5, 4  ;;  %v144_v7 = vmul.f32 %v132_v5, %v132_v5  ;;  %v133_v8 = vand.u32 2147483647, %v132_v5  ;;  %vm177_vm3 = vcmp.gt.f32.partialorder %v132_v5, 0.0  ;;  %s221_s15 = sshll.u32 %s430_s9, 4  ;;  %s222_s15 = int_to_ptr.vmem [resolvable:$true] %s221_s15 }
  0x3c   : > { %v178_v10 = vsel %vm177_vm3, 1.0, %v429_v9  ;;  %v188_v46 = vand.u32 127, %v187_v45  ;;  %s361_s18 = scalar_lea.vmem %s222_s15, 16  ;;  %s367_s19 = scalar_lea.vmem %s222_s15, 32 }
  0x3d   : > { %v137_v11 = vadd.f32 %v136_v6, %v132_v5  ;;  %v154_v12 = vmax.f32 %v132_v5, %v136_v6  ;;  %v145_v13 = vrot.slane %v144_v7, 4  ;;  %v162_v14 = vmin.f32 %v132_v5, %v136_v6  ;;  %p362_p8 = scmp.ne.s32.totalorder %s222_s15, %s361_s18  ;;  %p368_p6 = scmp.lt.s32.totalorder %s222_s15, %s222_s15 }
  0x3e   : > { %vm134_vm4 = vcmp.lt.f32.partialorder %v133_v8, 0.01  ;;  %v179_v15 = vrot.slane %v178_v10, 4  ;;  %vm189_vm5 = vcmp.eq.s32.totalorder %v188_v46, 0  ;;  %vm191_vm6 = vcmp.eq.s32.totalorder %v188_v46, 1  ;;  %p369_p11 = scmp.lt.s32.totalorder %s367_s19, %s361_s18 }
  0x3f   : > { %v138_v16 = vrot.slane %v137_v11, 2  ;;  %v155_v17 = vrot.slane %v154_v12, 2  ;;  %v146_v18 = vadd.f32 %v145_v13, %v144_v7  ;;  %v163_v19 = vrot.slane %v162_v14, 2  ;;  %p363_p10 = pnand %p362_p8, %p294_p7 }
  0x40   : > { %v135_v20 = vsel %vm134_vm4, 1.0, %v429_v9  ;;  %v180_v21 = vadd.f32 %v179_v15, %v178_v10  ;;  %vm194_vm7 = vcmp.eq.s32.totalorder %v188_v46, 2  ;;  %vm197_vm8 = vcmp.eq.s32.totalorder %v188_v46, 3  ;;  %v206_v63 = vld [vmem:[#allocation5] sm:$0x1]  ;;  %p370_p13 = por %p369_p11, %p368_p6 }
  0x41   : > { %v139_v22 = vadd.f32 %v138_v16, %v137_v11  ;;  %v156_v23 = vmax.f32 %v154_v12, %v155_v17  ;;  %v147_v24 = vrot.slane %v146_v18, 2  ;;  %v164_v25 = vmin.f32 %v162_v14, %v163_v19  ;;  %p364_p5 = pneg %p363_p10 }
  0x42   : > { %v169_v26 = vrot.slane %v135_v20, 4  ;;  %v181_v27 = vrot.slane %v180_v21, 2  ;;  %vm200_vm9 = vcmp.eq.s32.totalorder %v188_v46, 4  ;;  %vm203_vm10 = vcmp.eq.s32.totalorder %v188_v46, 5 }
  0x43   : > { %v140_v28 = vrot.slane %v139_v22, 1  ;;  %v157_v29 = vrot.slane %v156_v23, 1  ;;  %v148_v30 = vadd.f32 %v147_v24, %v146_v18  ;;  %v165_v31 = vrot.slane %v164_v25, 1  ;;  %p371_p1 = pnand %p370_p13, %p364_p5 }
  0x44   : > { %v170_v32 = vadd.f32 %v169_v26, %v135_v20  ;;  %v182_v33 = vadd.f32 %v181_v27, %v180_v21 }
  0x45   : > { %v141_v34 = vadd.f32 %v140_v28, %v139_v22  ;;  %v158_v35 = vmax.f32 %v156_v23, %v157_v29  ;;  %v149_v36 = vrot.slane %v148_v30, 1  ;;  %v166_v39 = vmin.f32 %v164_v25, %v165_v31 }
  0x46   : > { %v171_v37 = vrot.slane %v170_v32, 2  ;;  %v183_v40 = vrot.slane %v182_v33, 1 }
  0x47   : > { %142 = vadd.xlane.f32.xlu0 %v141_v34  ;;  %159 = vmax.xlane.f32.xlu1 %v158_v35  ;;  %v150_v38 = vadd.f32 %v149_v36, %v148_v30 }
  0x48   : > { %v172_v41 = vadd.f32 %v171_v37, %v170_v32  ;;  %v184_v43 = vadd.f32 %v183_v40, %v182_v33 }
  0x4a   : > { %v173_v42 = vrot.slane %v172_v41, 1 }
  0x4b   : > { %151 = vadd.xlane.f32.xlu0 %v150_v38  ;;  %167 = vmin.xlane.f32.xlu1 %v166_v39 }
  0x4c   : > { %v174_v44 = vadd.f32 %v173_v42, %v172_v41 }
  0x4f   : > { %175 = vadd.xlane.f32.xlu0 %v174_v44  ;;  %185 = vadd.xlane.f32.xlu1 %v184_v43 }
  0xd4   : > { %v143_v47 = vpop.xlane.xlu0 %142  ;;  %v160_v48 = vpop.xlane.xlu1 %159 }
  0xd5   : > { %v190_v51 = vsel %vm189_vm5, %v143_v47, 0.0  ;;  %v195_v54 = vsel %vm194_vm7, %v160_v48, 0.0 }
  0xd8   : > { %v152_v49 = vpop.xlane.xlu0 %151  ;;  %v168_v50 = vpop.xlane.xlu1 %167 }
  0xd9   : > { %v192_v52 = vsel %vm191_vm6, %v152_v49, 0.0  ;;  %v198_v55 = vsel %vm197_vm8, %v168_v50, 0.0 }
  0xda   : > { %v193_v53 = vadd.f32 %v192_v52, %v190_v51 }
  0xdc   : > { %v196_v56 = vadd.f32 %v195_v54, %v193_v53  ;;  %v176_v57 = vpop.xlane.xlu0 %175  ;;  %v186_v58 = vpop.xlane.xlu1 %185 }
  0xdd   : > { %v201_v59 = vsel %vm200_vm9, %v176_v57, 0.0  ;;  %v204_v61 = vsel %vm203_vm10, %v186_v58, 0.0 }
  0xde   : > { %v199_v60 = vadd.f32 %v198_v55, %v196_v56 }
  0xe0   : > { %v202_v62 = vadd.f32 %v201_v59, %v199_v60 }
  0xe2   : > { %v205_v0 = vadd.f32 %v204_v61, %v202_v62 }
  0xe4   : > { %v207_v1 = vmax.f32 %v206_v63, %v205_v0  ;;  %v208_v2 = vmin.f32 %v206_v63, %v205_v0  ;;  %v209_v3 = vadd.f32 %v206_v63, %v205_v0 }
  0xe6   : > { %v210_v4 = vsel %vm197_vm8, %v208_v2, %v209_v3 }
  0xe7   : > { %v211_v5 = vsel %vm194_vm7, %v207_v1, %v210_v4 }
  0xe8   : > { %213 = vst.msk [vmem:[#allocation5] sm:$0x1] %vm212_vm11, %v211_v5 }
  0xe9   : > { %374 = shalt.err (!%p371_p1)
}
  0xea   : > { %s375_s22 = scalar_lea.hbm %s572_s1, 16 }
  0xeb   : > { %p376_p2 = scmp.ne.s32.totalorder %s572_s1, %s375_s22  ;;  %p381_p4 = scmp.lt.u32.totalorder %s375_s22, %s572_s1 }
  0xed   : > { %p377_p3 = pnand %p376_p2, %p294_p7 }
  0xef   : > { %p378_p0 = pneg %p377_p3 }
  0xf1   : > { %p383_p12 = pnand %p381_p4, %p378_p0 }
  0xf3   : > { %386 = shalt.err (!%p383_p12)
}
  0xf4   : > { %286 = dma.vmem_to_hbm [thread:$0]  (%p294_p7), %s222_s15, 16, %s572_s1, [#allocation4]  }
  0xf5   : > { %408 = dma.done.wait (%p294_p7), [#allocation4], 16  }
  0xf6   : > { %410 = vsyncadd (%p294_p7), [#allocation4], 4294967280 }
  0xf7 PF: > { %p12_p9 = scmp.ge.s32.totalorder %s463_s11, 4   ;;  %s577_s6 = smov %s417_s7 }
  0xf8   : > { %s578_s7 = smov %s421_s8  ;;  %s579_s8 = smov %s473_s14 }
  0xf9   : > { %s580_s9 = smov %s463_s11  ;;  %14 = sbr.rel (!%p12_p9) target bundleno = 4 (0x4), region = 65 }
 0x100   :  { %234 = vsyncpa [#allocation3], 1 }
 0x101   :  { %236 = vsyncpa [#allocation3 + $0x1], 1 }
 0x102   :  { %237 = vsyncpa [#allocation4], 1 }
 0x103   :  { %239 = vsyncpa [#allocation4 + $0x1], 1 }

</bundles_post_ra>
